<compile_context>
chip_gen: v5e
topology: v5e:2x2
jax: 0.10.0
libtpu: 0.0.40
codegen_flags: <defaults>
</compile_context>

<pallas_src>
import jax
import jax.numpy as jnp
from jax.experimental import pallas as pl
from jax.experimental.pallas import tpu as pltpu

LN_EPS = 1e-5  # torch.nn.LayerNorm default eps (gamma=1, beta=0: fresh LN each fwd)


def _layernorm_axis0(h, n_feat):
    # LayerNorm over the feature (sublane) axis, f32 math, single pass.
    inv_n = 1.0 / float(n_feat)
    s = jnp.sum(h, axis=0, keepdims=True)
    s2 = jnp.sum(h * h, axis=0, keepdims=True)
    mu = s * inv_n
    var = jnp.maximum(s2 * inv_n - mu * mu, 0.0)
    return (h - mu) * jax.lax.rsqrt(var + LN_EPS)


def mlp_kernel(xt_ref, w1_ref, b1_ref, w2_ref, b2_ref, w3_ref, b3_ref, ot_ref):
    # fc1: (128, TB) = (128, 9)bf16 @ (9, TB)bf16, f32 accumulation.
    h1 = jnp.dot(w1_ref[...], xt_ref[...], preferred_element_type=jnp.float32)
    h1 = jnp.maximum(h1 + b1_ref[...], 0.0)
    h1 = _layernorm_axis0(h1, 128)

    # fc2: (32, TB) = (32, 128)bf16 @ (128, TB)bf16, f32 accumulation.
    h2 = jnp.dot(w2_ref[...], h1.astype(jnp.bfloat16),
                 preferred_element_type=jnp.float32)
    h2 = jnp.maximum(h2 + b2_ref[...], 0.0)
    h2 = _layernorm_axis0(h2, 32)

    # fc3 (K=32, N=1): VPU multiply + sublane reduction, keeps it off the MXU.
    out = jnp.sum(h2 * w3_ref[...], axis=0, keepdims=True) + b3_ref[...]
    ot_ref[...] = out.astype(ot_ref.dtype)  # (1, TB): full-lane unmasked store


def _round_up(n, m):
    return ((n + m - 1) // m) * m


def net_forward(x, params, *, batch_tile=1024):
    """params: (w1(128,9) bf16, b1(128,1) f32, w2(32,128) bf16, b2(32,1) f32,
                w3(32,1) f32, b3(1,1) f32)  -- torch (out, in) weight layout."""
    w1, b1, w2, b2, w3, b3 = params
    B = x.shape[0]
    x2d = x.reshape(B, -1)  # x.view(-1, num_flat_features(x))
    assert x2d.shape[1] == 9, "Net expects 9 flat features per example"

    tb = min(batch_tile, _round_up(B, 128))   # lane-aligned batch tile
    bp = _round_up(B, tb)                     # padded batch

    # Transposed, bf16, zero-padded input: batch on the lane axis.
    xt = jnp.zeros((9, bp), jnp.bfloat16).at[:, :B].set(
        x2d.astype(jnp.bfloat16).T)

    resident = lambda i: (0, 0)  # weights/biases: same block every grid step
    out_t = pl.pallas_call(
        mlp_kernel,
        out_shape=jax.ShapeDtypeStruct((1, bp), jnp.float32),
        grid=(bp // tb,),
        in_specs=[
            pl.BlockSpec((9, tb), lambda i: (0, i)),   # streamed x tile
            pl.BlockSpec((128, 9), resident),          # w1
            pl.BlockSpec((128, 1), resident),          # b1
            pl.BlockSpec((32, 128), resident),         # w2
            pl.BlockSpec((32, 1), resident),           # b2
            pl.BlockSpec((32, 1), resident),           # w3 (as a column)
            pl.BlockSpec((1, 1), resident),            # b3
        ],
        out_specs=pl.BlockSpec((1, tb), lambda i: (0, i)),
        compiler_params=pltpu.CompilerParams(
            dimension_semantics=("parallel",)),
    )(xt, w1, b1, w2, b2, w3, b3)

    return out_t[0, :B].reshape(B, 1)


def init_params(key):
    # PyTorch nn.Linear-style init: U(-1/sqrt(fan_in), 1/sqrt(fan_in)),
    # stored in torch's (out_features, in_features) layout.
    def linear(k, fan_in, fan_out, w_dtype):
        kw, kb = jax.random.split(k)
        bound = 1.0 / float(fan_in) ** 0.5
        w = jax.random.uniform(kw, (fan_out, fan_in), jnp.float32, -bound, bound)
        b = jax.random.uniform(kb, (fan_out, 1), jnp.float32, -bound, bound)
        return w.astype(w_dtype), b

    k1, k2, k3 = jax.random.split(key, 3)
    w1, b1 = linear(k1, 9, 128, jnp.bfloat16)     # MXU operand -> bf16 stream
    w2, b2 = linear(k2, 128, 32, jnp.bfloat16)    # MXU operand -> bf16 stream
    w3r, b3r = linear(k3, 32, 1, jnp.float32)     # used on VPU -> keep f32
    w3 = w3r.T                                    # (32, 1) column
    b3 = b3r.reshape(1, 1)
    return (w1, b1, w2, b2, w3, b3)


def net_reference(x, params):
    # Pure-JAX reference (f32 activations, same bf16-quantized weights).
    w1, b1, w2, b2, w3, b3 = params
    B = x.shape[0]
    h = x.reshape(B, -1).astype(jnp.float32)

    def ln(v):
        mu = jnp.mean(v, axis=-1, keepdims=True)
        var = jnp.mean((v - mu) ** 2, axis=-1, keepdims=True)
        return (v - mu) * jax.lax.rsqrt(var + LN_EPS)

    h = ln(jnp.maximum(h @ w1.astype(jnp.float32).T + b1[:, 0], 0.0))
    h = ln(jnp.maximum(h @ w2.astype(jnp.float32).T + b2[:, 0], 0.0))
    return h @ w3 + b3[0, 0]


if __name__ == "__main__":
    key = jax.random.PRNGKey(0)
    kx, kp = jax.random.split(key)

    # Small input consistent with .view(-1, 9): batch=8, 3x3 features each.
    x = jax.random.normal(kx, (8, 3, 3), dtype=jnp.float32)
    params = init_params(kp)

    out = jax.block_until_ready(net_forward(x, params))
    ref = jax.block_until_ready(net_reference(x, params))

    assert out.shape == (8, 1)
    assert bool(jnp.all(jnp.isfinite(out)))
    # Loose tolerance: kernel streams x / intermediate h1 in bf16.
    assert bool(jnp.allclose(out, ref, atol=1e-1, rtol=0.0)), (
        "max abs err %f" % float(jnp.max(jnp.abs(out - ref))))
    print("KERNEL_OK")
</pallas_src>

<mosaic_0001>
module attributes {stable_mosaic.version = 11 : i64} {
  func.func @mlp_kernel(%arg0: i32, %arg1: memref<9x128xbf16, #tpu.memory_space<vmem>>, %arg2: memref<128x9xbf16, #tpu.memory_space<vmem>>, %arg3: memref<128x1xf32, #tpu.memory_space<vmem>>, %arg4: memref<32x128xbf16, #tpu.memory_space<vmem>>, %arg5: memref<32x1xf32, #tpu.memory_space<vmem>>, %arg6: memref<32x1xf32, #tpu.memory_space<vmem>>, %arg7: memref<1x1xf32, #tpu.memory_space<vmem>>, %arg8: memref<1x128xf32, #tpu.memory_space<vmem>>) attributes {dimension_semantics = [#tpu.dimension_semantics<parallel>], iteration_bounds = array<i64: 1>, scalar_prefetch = 0 : i64, scratch_operands = 0 : i64, tpu.core_type = #tpu.core_type<tc>, window_params = [{transform_indices = @transform_0, window_bounds = array<i64: 9, 128>}, {pipeline_mode = #tpu.pipeline_mode<synchronous>, transform_indices = @transform_1, window_bounds = array<i64: 128, 9>}, {pipeline_mode = #tpu.pipeline_mode<synchronous>, transform_indices = @transform_2, window_bounds = array<i64: 128, 1>}, {pipeline_mode = #tpu.pipeline_mode<synchronous>, transform_indices = @transform_3, window_bounds = array<i64: 32, 128>}, {pipeline_mode = #tpu.pipeline_mode<synchronous>, transform_indices = @transform_4, window_bounds = array<i64: 32, 1>}, {pipeline_mode = #tpu.pipeline_mode<synchronous>, transform_indices = @transform_5, window_bounds = array<i64: 32, 1>}, {pipeline_mode = #tpu.pipeline_mode<synchronous>, transform_indices = @transform_6, window_bounds = array<i64: 1, 1>}, {transform_indices = @transform_7, window_bounds = array<i64: 1, 128>}]} {
    %c0 = arith.constant 0 : index
    %c0_0 = arith.constant 0 : index
    %0 = vector.load %arg2[%c0, %c0_0] : memref<128x9xbf16, #tpu.memory_space<vmem>>, vector<128x9xbf16>
    %c0_1 = arith.constant 0 : index
    %c0_2 = arith.constant 0 : index
    %1 = vector.load %arg1[%c0_1, %c0_2] : memref<9x128xbf16, #tpu.memory_space<vmem>>, vector<9x128xbf16>
    %cst = arith.constant dense<0.000000e+00> : vector<128x128xf32>
    %2 = tpu.matmul %0, %1, %cst {dimension_numbers = #tpu.dot_dimension_numbers<[1], [0], [0], [1], [0, 0, 1, 1], [], []>} : vector<128x9xbf16>, vector<9x128xbf16>, vector<128x128xf32> -> vector<128x128xf32>
    %c0_3 = arith.constant 0 : index
    %c0_4 = arith.constant 0 : index
    %3 = vector.load %arg3[%c0_3, %c0_4] : memref<128x1xf32, #tpu.memory_space<vmem>>, vector<128x1xf32>
    %4 = vector.broadcast %3 : vector<128x1xf32> to vector<128x128xf32>
    %5 = arith.addf %2, %4 : vector<128x128xf32>
    %cst_5 = arith.constant 0.000000e+00 : f32
    %6 = vector.broadcast %cst_5 : f32 to vector<128x128xf32>
    %7 = arith.maximumf %5, %6 : vector<128x128xf32>
    %cst_6 = arith.constant dense<0.000000e+00> : vector<128xf32>
    %8 = vector.multi_reduction <add>, %7, %cst_6 [0] : vector<128x128xf32> to vector<128xf32>
    %9 = vector.shape_cast %8 : vector<128xf32> to vector<1x128xf32>
    %10 = arith.mulf %7, %7 : vector<128x128xf32>
    %cst_7 = arith.constant dense<0.000000e+00> : vector<128xf32>
    %11 = vector.multi_reduction <add>, %10, %cst_7 [0] : vector<128x128xf32> to vector<128xf32>
    %12 = vector.shape_cast %11 : vector<128xf32> to vector<1x128xf32>
    %cst_8 = arith.constant 7.812500e-03 : f32
    %13 = vector.broadcast %cst_8 : f32 to vector<1x128xf32>
    %14 = arith.mulf %9, %13 : vector<1x128xf32>
    %cst_9 = arith.constant 7.812500e-03 : f32
    %15 = vector.broadcast %cst_9 : f32 to vector<1x128xf32>
    %16 = arith.mulf %12, %15 : vector<1x128xf32>
    %17 = arith.mulf %14, %14 : vector<1x128xf32>
    %18 = arith.subf %16, %17 : vector<1x128xf32>
    %cst_10 = arith.constant 0.000000e+00 : f32
    %19 = vector.broadcast %cst_10 : f32 to vector<1x128xf32>
    %20 = arith.maximumf %18, %19 : vector<1x128xf32>
    %21 = vector.broadcast %14 : vector<1x128xf32> to vector<128x128xf32>
    %22 = arith.subf %7, %21 : vector<128x128xf32>
    %cst_11 = arith.constant 9.99999974E-6 : f32
    %23 = vector.broadcast %cst_11 : f32 to vector<1x128xf32>
    %24 = arith.addf %20, %23 : vector<1x128xf32>
    %25 = math.rsqrt %24 : vector<1x128xf32>
    %26 = vector.broadcast %25 : vector<1x128xf32> to vector<128x128xf32>
    %27 = arith.mulf %22, %26 : vector<128x128xf32>
    %c0_12 = arith.constant 0 : index
    %c0_13 = arith.constant 0 : index
    %28 = vector.load %arg4[%c0_12, %c0_13] : memref<32x128xbf16, #tpu.memory_space<vmem>>, vector<32x128xbf16>
    %29 = arith.truncf %27 : vector<128x128xf32> to vector<128x128xbf16>
    %cst_14 = arith.constant dense<0.000000e+00> : vector<32x128xf32>
    %30 = tpu.matmul %28, %29, %cst_14 {dimension_numbers = #tpu.dot_dimension_numbers<[1], [0], [0], [1], [0, 0, 1, 1], [], []>} : vector<32x128xbf16>, vector<128x128xbf16>, vector<32x128xf32> -> vector<32x128xf32>
    %c0_15 = arith.constant 0 : index
    %c0_16 = arith.constant 0 : index
    %31 = vector.load %arg5[%c0_15, %c0_16] : memref<32x1xf32, #tpu.memory_space<vmem>>, vector<32x1xf32>
    %32 = vector.broadcast %31 : vector<32x1xf32> to vector<32x128xf32>
    %33 = arith.addf %30, %32 : vector<32x128xf32>
    %cst_17 = arith.constant 0.000000e+00 : f32
    %34 = vector.broadcast %cst_17 : f32 to vector<32x128xf32>
    %35 = arith.maximumf %33, %34 : vector<32x128xf32>
    %cst_18 = arith.constant dense<0.000000e+00> : vector<128xf32>
    %36 = vector.multi_reduction <add>, %35, %cst_18 [0] : vector<32x128xf32> to vector<128xf32>
    %37 = vector.shape_cast %36 : vector<128xf32> to vector<1x128xf32>
    %38 = arith.mulf %35, %35 : vector<32x128xf32>
    %cst_19 = arith.constant dense<0.000000e+00> : vector<128xf32>
    %39 = vector.multi_reduction <add>, %38, %cst_19 [0] : vector<32x128xf32> to vector<128xf32>
    %40 = vector.shape_cast %39 : vector<128xf32> to vector<1x128xf32>
    %cst_20 = arith.constant 3.125000e-02 : f32
    %41 = vector.broadcast %cst_20 : f32 to vector<1x128xf32>
    %42 = arith.mulf %37, %41 : vector<1x128xf32>
    %cst_21 = arith.constant 3.125000e-02 : f32
    %43 = vector.broadcast %cst_21 : f32 to vector<1x128xf32>
    %44 = arith.mulf %40, %43 : vector<1x128xf32>
    %45 = arith.mulf %42, %42 : vector<1x128xf32>
    %46 = arith.subf %44, %45 : vector<1x128xf32>
    %cst_22 = arith.constant 0.000000e+00 : f32
    %47 = vector.broadcast %cst_22 : f32 to vector<1x128xf32>
    %48 = arith.maximumf %46, %47 : vector<1x128xf32>
    %49 = vector.broadcast %42 : vector<1x128xf32> to vector<32x128xf32>
    %50 = arith.subf %35, %49 : vector<32x128xf32>
    %cst_23 = arith.constant 9.99999974E-6 : f32
    %51 = vector.broadcast %cst_23 : f32 to vector<1x128xf32>
    %52 = arith.addf %48, %51 : vector<1x128xf32>
    %53 = math.rsqrt %52 : vector<1x128xf32>
    %54 = vector.broadcast %53 : vector<1x128xf32> to vector<32x128xf32>
    %55 = arith.mulf %50, %54 : vector<32x128xf32>
    %c0_24 = arith.constant 0 : index
    %c0_25 = arith.constant 0 : index
    %56 = vector.load %arg6[%c0_24, %c0_25] : memref<32x1xf32, #tpu.memory_space<vmem>>, vector<32x1xf32>
    %57 = vector.broadcast %56 : vector<32x1xf32> to vector<32x128xf32>
    %58 = arith.mulf %55, %57 : vector<32x128xf32>
    %cst_26 = arith.constant dense<0.000000e+00> : vector<128xf32>
    %59 = vector.multi_reduction <add>, %58, %cst_26 [0] : vector<32x128xf32> to vector<128xf32>
    %60 = vector.shape_cast %59 : vector<128xf32> to vector<1x128xf32>
    %c0_27 = arith.constant 0 : index
    %c0_28 = arith.constant 0 : index
    %61 = vector.load %arg7[%c0_27, %c0_28] : memref<1x1xf32, #tpu.memory_space<vmem>>, vector<1x1xf32>
    %62 = vector.broadcast %61 : vector<1x1xf32> to vector<1x128xf32>
    %63 = arith.addf %60, %62 : vector<1x128xf32>
    %c0_29 = arith.constant 0 : index
    %c0_30 = arith.constant 0 : index
    %64 = vector.load %arg8[%c0_29, %c0_30] : memref<1x128xf32, #tpu.memory_space<vmem>>, vector<1x128xf32>
    tpu.vector_store %arg8[%c0_29, %c0_30], %63 {strides = array<i32>} : memref<1x128xf32, #tpu.memory_space<vmem>>, vector<1x128xf32>,
    return
  }
  func.func @transform_0(%arg0: i32) -> (i32, i32) {
    %c0_i32 = arith.constant 0 : i32
    %c0_i32_0 = arith.constant 0 : i32
    return %c0_i32, %arg0 : i32, i32
  }
  func.func @transform_1(%arg0: i32) -> (i32, i32) {
    %c0_i32 = arith.constant 0 : i32
    %c0_i32_0 = arith.constant 0 : i32
    %c0_i32_1 = arith.constant 0 : i32
    return %c0_i32, %c0_i32_0 : i32, i32
  }
  func.func @transform_2(%arg0: i32) -> (i32, i32) {
    %c0_i32 = arith.constant 0 : i32
    %c0_i32_0 = arith.constant 0 : i32
    %c0_i32_1 = arith.constant 0 : i32
    return %c0_i32, %c0_i32_0 : i32, i32
  }
  func.func @transform_3(%arg0: i32) -> (i32, i32) {
    %c0_i32 = arith.constant 0 : i32
    %c0_i32_0 = arith.constant 0 : i32
    %c0_i32_1 = arith.constant 0 : i32
    return %c0_i32, %c0_i32_0 : i32, i32
  }
  func.func @transform_4(%arg0: i32) -> (i32, i32) {
    %c0_i32 = arith.constant 0 : i32
    %c0_i32_0 = arith.constant 0 : i32
    %c0_i32_1 = arith.constant 0 : i32
    return %c0_i32, %c0_i32_0 : i32, i32
  }
  func.func @transform_5(%arg0: i32) -> (i32, i32) {
    %c0_i32 = arith.constant 0 : i32
    %c0_i32_0 = arith.constant 0 : i32
    %c0_i32_1 = arith.constant 0 : i32
    return %c0_i32, %c0_i32_0 : i32, i32
  }
  func.func @transform_6(%arg0: i32) -> (i32, i32) {
    %c0_i32 = arith.constant 0 : i32
    %c0_i32_0 = arith.constant 0 : i32
    %c0_i32_1 = arith.constant 0 : i32
    return %c0_i32, %c0_i32_0 : i32, i32
  }
  func.func @transform_7(%arg0: i32) -> (i32, i32) {
    %c0_i32 = arith.constant 0 : i32
    %c0_i32_0 = arith.constant 0 : i32
    return %c0_i32, %arg0 : i32, i32
  }
}

</mosaic_0001>

<bundles_post_ra>
// kernel: tpu_custom_call.1
= control target key start
LH: loop header
LB: loop body
LE: loop exit
PB: predicated region body
PF: predicated region fallthrough
CT: control target
= control target key end

     0   :  { %s949_s0 = inlined_call_operand.vmem [shape: bf16[9,128], index: 0, kind: input, shape index: {}]   ;;  %s950_s1 = inlined_call_operand.vmem [shape: bf16[128,9], index: 1, kind: input, shape index: {}]   ;;  %s951_s2 = inlined_call_operand.vmem [shape: f32[128,1], index: 2, kind: input, shape index: {}]   ;;  %s952_s3 = inlined_call_operand.vmem [shape: bf16[32,128], index: 3, kind: input, shape index: {}]   ;;  %s953_s4 = inlined_call_operand.vmem [shape: f32[32,1], index: 4, kind: input, shape index: {}]   ;;  %s954_s5 = inlined_call_operand.vmem [shape: f32[32,1], index: 5, kind: input, shape index: {}]   ;;  %s955_s6 = inlined_call_operand.<no memory space> [shape: f32[1,1], index: 6, kind: input, shape index: {}]   ;;  %s956_s7 = inlined_call_operand.hbm [shape: f32[1,128], index: 7, kind: output, shape index: {}]  }
   0x1   :  { %v12_v0 = vstv %s955_s6 }
   0x2   :  { %13 = vst [vmem:[#allocation2] sm:$0x1] %v12_v0 }
   0x3   :  { %v50_v1 = vld [vmem:[%s951_s2 + $0x10] sm:$0xff]  ;;  %v48_v2 = vld [vmem:[%s951_s2] sm:$0xff]  ;;  %vm214_vm0 = vcmask 1043456   ;;  %v680_v4 = vmov 0   ;;  %vm215_vm1 = vcmask 1044480   ;;  %v681_v7 = vmov 65535  }
   0x4   :  { %v605_v3 = vld [vmem:[%s949_s0] sm:$0xf]  ;;  %648 = vset.pattern.permute.xlu1 %v680_v4  ;;  %647 = vset.pattern.permute.xlu0 %v680_v4  ;;  %v631_v5 = vld [vmem:[%s949_s0] sm:$0x10]  ;;  %v216_v8 = vsel %vm214_vm0, 4294967295, %v681_v7  ;;  %v626_v13 = vld [vmem:[%s950_s1 + $0x18] sm:$0xff] }
   0x5   :  { %76 = vperm.xlu1 %648, %v50_v1   ;;  %66 = vperm.xlu0 %647, %v48_v2   ;;  %v606_v6 = vor.u32 %v631_v5, %v605_v3  ;;  %v217_v9 = vsel %vm215_vm1, %v216_v8, 0  ;;  %v52_v10 = vld [vmem:[%s951_s2 + $0x20] sm:$0xff]  ;;  %vm189_vm2 = vcmask 72704   ;;  %v629_v14 = vld [vmem:[%s950_s1 + $0x30] sm:$0xff]  ;;  %v51_v15 = vld [vmem:[%s951_s2 + $0x18] sm:$0xff] }
   0x6   :  { %649 = vset.pattern.permute.xlu2 %v680_v4  ;;  %v623_v12 = vld [vmem:[%s950_s1] sm:$0xff]  ;;  %v49_v16 = vld [vmem:[%s951_s2 + $0x8] sm:$0xff] }
   0x7   :  { %v219_v11 = vand.u32 %v606_v6, %v217_v9  ;;  %86 = vperm.xlu2 %649, %v52_v10  }
   0x9   :  { %228 = vmatpush.bf16.msra.mxu0 %v219_v11  ;;  %634 = vmatpush.bf16.msra.mxu2 %v219_v11 }
   0xa   :  { %635 = vmatpush.bf16.msra.mxu3 %v219_v11 }
   0xb   :  { %14 = vsyncpa [#allocation4], 0  ;;  %v53_v17 = vld [vmem:[%s951_s2 + $0x28] sm:$0xff]  ;;  %v55_v18 = vld [vmem:[%s951_s2 + $0x38] sm:$0xff]  ;;  %s562_s22 = sshll.u32 %s956_s7, 4  ;;  %s563_s22 = int_to_ptr.hbm [resolvable:$true] %s562_s22 }
   0xc   :  { %607 = vmatmul.msk.bf16.vlgmr.msra.gmra.mxu0 %vm189_vm2, %v623_v12  ;;  %610 = vmatmul.msk.bf16.vlgmr.msra.gmra.mxu2 %vm189_vm2, %v626_v13  ;;  %v54_v19 = vld [vmem:[%s951_s2 + $0x30] sm:$0xff]  ;;  %v56_v20 = vld [vmem:[%s951_s2 + $0x40] sm:$0xff]  ;;  %v624_v21 = vld [vmem:[%s950_s1 + $0x8] sm:$0xff] }
   0xd   :  { %613 = vmatmul.msk.bf16.vlgmr.msra.gmra.mxu3 %vm189_vm2, %v629_v14  ;;  %81 = vperm.xlu1 %648, %v51_v15   ;;  %v627_v22 = vld [vmem:[%s950_s1 + $0x20] sm:$0xff]  ;;  %v630_v23 = vld [vmem:[%s950_s1 + $0x38] sm:$0xff]  ;;  %v58_v24 = vld [vmem:[%s951_s2 + $0x50] sm:$0xff] }
   0xe   :  { %71 = vperm.xlu0 %647, %v49_v16   ;;  %v57_v25 = vld [vmem:[%s951_s2 + $0x48] sm:$0xff]  ;;  %v59_v26 = vld [vmem:[%s951_s2 + $0x58] sm:$0xff]  ;;  %v60_v28 = vld [vmem:[%s951_s2 + $0x60] sm:$0xff] }
   0xf   :  { %91 = vperm.xlu2 %649, %v53_v17   ;;  %v61_v27 = vld [vmem:[%s951_s2 + $0x68] sm:$0xff]  ;;  %v62_v29 = vld [vmem:[%s951_s2 + $0x70] sm:$0xff]  ;;  %v404_v32 = vld [vmem:[%s953_s4] sm:$0xff] }
  0x10   :  { %v625_v30 = vld [vmem:[%s950_s1 + $0x10] sm:$0xff]  ;;  %v628_v31 = vld [vmem:[%s950_s1 + $0x28] sm:$0xff]  ;;  %v63_v33 = vld [vmem:[%s951_s2 + $0x78] sm:$0xff] }
  0x11   :  { %v405_v34 = vld [vmem:[%s953_s4 + $0x8] sm:$0xff]  ;;  %v407_v35 = vld [vmem:[%s953_s4 + $0x18] sm:$0xff]  ;;  %v406_v36 = vld [vmem:[%s953_s4 + $0x10] sm:$0xff] }
  0x12   :  { %v509_v37 = vld [vmem:[%s954_s5] sm:$0xff]  ;;  %v511_v38 = vld [vmem:[%s954_s5 + $0x10] sm:$0xff]  ;;  %v510_v39 = vld [vmem:[%s954_s5 + $0x8] sm:$0xff] }
  0x13   :  { %v512_v40 = vld [vmem:[%s954_s5 + $0x18] sm:$0xff]  ;;  %v546_v41 = vld [vmem:[#allocation2] sm:$0x1] }
  0x15   :  { %101 = vperm.xlu1 %648, %v55_v18  }
  0x16   :  { %96 = vperm.xlu0 %647, %v54_v19  }
  0x17   :  { %106 = vperm.xlu2 %649, %v56_v20  }
  0x1c   :  { %608 = vmatmul.msk.bf16.gmra.mxu0 %vm189_vm2, %v624_v21  ;;  %611 = vmatmul.msk.bf16.gmra.mxu2 %vm189_vm2, %v627_v22 }
  0x1d   :  { %614 = vmatmul.msk.bf16.gmra.mxu3 %vm189_vm2, %v630_v23  ;;  %116 = vperm.xlu1 %648, %v58_v24  }
  0x1e   :  { %111 = vperm.xlu0 %647, %v57_v25  }
  0x1f   :  { %121 = vperm.xlu2 %649, %v59_v26  }
  0x25   :  { %131 = vperm.xlu1 %648, %v61_v27  }
  0x26   :  { %126 = vperm.xlu0 %647, %v60_v28  }
  0x27   :  { %136 = vperm.xlu2 %649, %v62_v29  }
  0x2c   :  { %609 = vmatmul.msk.bf16.gmra.mxu0 %vm189_vm2, %v625_v30  ;;  %612 = vmatmul.msk.bf16.gmra.mxu2 %vm189_vm2, %v628_v31 }
  0x2d   :  { %410 = vperm.xlu1 %648, %v404_v32  }
  0x2e   :  { %141 = vperm.xlu0 %647, %v63_v33  }
  0x2f   :  { %415 = vperm.xlu2 %649, %v405_v34  }
  0x35   :  { %425 = vperm.xlu1 %648, %v407_v35  }
  0x36   :  { %420 = vperm.xlu0 %647, %v406_v36  }
  0x37   :  { %515 = vperm.xlu2 %649, %v509_v37  }
  0x3d   :  { %525 = vperm.xlu1 %648, %v511_v38  }
  0x3e   :  { %520 = vperm.xlu0 %647, %v510_v39  }
  0x3f   :  { %530 = vperm.xlu2 %649, %v512_v40  }
  0x46   :  { %549 = vperm.xlu0 %647, %v546_v41  }
  0x61   :  { %v87_v47 = vpop.permute.xlu2 %86 }
  0x69   :  { %v92_v53 = vpop.permute.xlu2 %91 }
  0x71   :  { %v107_v4 = vpop.permute.xlu2 %106 }
  0x77   :  { %v67_v43 = vpop.permute.xlu0 %66  ;;  %v77_v46 = vpop.permute.xlu1 %76 }
  0x79   :  { %v122_v30 = vpop.permute.xlu2 %121 }
  0x7f   :  { %v82_v51 = vpop.permute.xlu1 %81 }
  0x80   :  { %v72_v49 = vpop.permute.xlu0 %71 }
  0x87   :  { %v102_v61 = vpop.permute.xlu1 %101 }
  0x88   :  { %v97_v56 = vpop.permute.xlu0 %96 }
  0x89   :  { %v230_v42 = vpop.f32.mrf.mxu0 }
  0x8a   :  { %v231_v58 = vadd.f32 %v230_v42, %v67_v43 }
  0x8c   :  { %v838_v1 = vmax.f32 %v231_v58, 0.0 }
  0x8e   :  { %v307_v9 = vmul.f32 %v838_v1, %v838_v1 }
  0x8f   :  { %v245_v44 = vpop.f32.mrf.mxu2  ;;  %v117_v20 = vpop.permute.xlu1 %116 }
  0x90   :  { %v260_v54 = vpop.f32.mrf.mxu3  ;;  %v112_v8 = vpop.permute.xlu0 %111  ;;  %v246_v13 = vadd.f32 %v245_v44, %v97_v56 }
  0x91   :  { %v232_v45 = vpop.f32.mrf.mxu0 }
  0x92   :  { %v233_v57 = vadd.f32 %v232_v45, %v72_v49  ;;  %v860_v25 = vmax.f32 %v246_v13, 0.0 }
  0x94   :  { %v836_v62 = vmax.f32 %v233_v57, 0.0  ;;  %v313_v37 = vmul.f32 %v860_v25, %v860_v25 }
  0x96   :  { %v308_v6 = vmul.f32 %v836_v62, %v836_v62  ;;  %v286_v10 = vadd.f32 %v836_v62, %v838_v1 }
  0x97   :  { %v247_v48 = vpop.f32.mrf.mxu2 }
  0x98   :  { %v262_v5 = vpop.f32.mrf.mxu3  ;;  %v323_v15 = vadd.f32 %v308_v6, %v307_v9  ;;  %v248_v18 = vadd.f32 %v247_v48, %v102_v61  ;;  %v127_v38 = vpop.permute.xlu0 %126 }
  0x99   :  { %v235_v50 = vpop.f32.mrf.mxu0  ;;  %v261_v49 = vadd.f32 %v260_v54, %v127_v38  ;;  %v137_v61 = vpop.permute.xlu2 %136 }
  0x9a   :  { %v236_v59 = vadd.f32 %v235_v50, %v77_v46  ;;  %v865_v31 = vmax.f32 %v248_v18, 0.0  ;;  %v132_v50 = vpop.permute.xlu1 %131 }
  0x9b   :  { %v263_v56 = vadd.f32 %v262_v5, %v132_v50  ;;  %v890_v54 = vmax.f32 %v261_v49, 0.0 }
  0x9c   :  { %v840_v2 = vmax.f32 %v236_v59, 0.0  ;;  %v314_v44 = vmul.f32 %v865_v31, %v865_v31 }
  0x9d   :  { %v895_v5 = vmax.f32 %v263_v56, 0.0 }
  0x9e   :  { %v309_v11 = vmul.f32 %v840_v2, %v840_v2  ;;  %v287_v16 = vadd.f32 %v286_v10, %v840_v2 }
  0x9f   :  { %v250_v52 = vpop.f32.mrf.mxu2  ;;  %v320_v18 = vmul.f32 %v895_v5, %v895_v5 }
  0xa0   :  { %v324_v21 = vadd.f32 %v323_v15, %v309_v11  ;;  %v251_v26 = vadd.f32 %v250_v52, %v107_v4  ;;  %v265_v32 = vpop.f32.mrf.mxu3 }
  0xa1   :  { %v237_v55 = vpop.f32.mrf.mxu0 }
  0xa2   :  { %v238_v63 = vadd.f32 %v237_v55, %v82_v51  ;;  %v872_v40 = vmax.f32 %v251_v26, 0.0 }
  0xa4   :  { %v844_v7 = vmax.f32 %v238_v63, 0.0  ;;  %v315_v51 = vmul.f32 %v872_v40, %v872_v40 }
  0xa6   :  { %v310_v17 = vmul.f32 %v844_v7, %v844_v7  ;;  %v288_v22 = vadd.f32 %v287_v16, %v844_v7 }
  0xa7   :  { %v252_v60 = vpop.f32.mrf.mxu2 }
  0xa8   :  { %v325_v27 = vadd.f32 %v324_v21, %v310_v17  ;;  %v253_v33 = vadd.f32 %v252_v60, %v112_v8  ;;  %v267_v63 = vpop.f32.mrf.mxu3  ;;  %v142_v8 = vpop.permute.xlu0 %141 }
  0xa9   :  { %v240_v0 = vpop.f32.mrf.mxu0  ;;  %v268_v9 = vadd.f32 %v267_v63, %v142_v8 }
  0xaa   :  { %v241_v3 = vadd.f32 %v240_v0, %v87_v47  ;;  %v877_v45 = vmax.f32 %v253_v33, 0.0  ;;  %v266_v0 = vadd.f32 %v265_v32, %v137_v61 }
  0xac   :  { %v852_v12 = vmax.f32 %v241_v3, 0.0  ;;  %v316_v57 = vmul.f32 %v877_v45, %v877_v45  ;;  %v284_v15 = vmax.f32 %v266_v0, 0.0 }
  0xae   :  { %v311_v23 = vmul.f32 %v852_v12, %v852_v12  ;;  %v289_v28 = vadd.f32 %v288_v22, %v852_v12  ;;  %v321_v22 = vmul.f32 %v284_v15, %v284_v15 }
  0xaf   :  { %v255_v14 = vpop.f32.mrf.mxu2 }
  0xb0   :  { %v326_v34 = vadd.f32 %v325_v27, %v311_v23  ;;  %v256_v41 = vadd.f32 %v255_v14, %v117_v20  ;;  %v319_v14 = vmul.f32 %v890_v54, %v890_v54 }
  0xb1   :  { %v242_v19 = vpop.f32.mrf.mxu0 }
  0xb2   :  { %v243_v24 = vadd.f32 %v242_v19, %v92_v53  ;;  %v882_v52 = vmax.f32 %v256_v41, 0.0  ;;  %v285_v19 = vmax.f32 %v268_v9, 0.0 }
  0xb4   :  { %v863_v29 = vmax.f32 %v243_v24, 0.0  ;;  %v317_v3 = vmul.f32 %v882_v52, %v882_v52  ;;  %v322_v26 = vmul.f32 %v285_v19, %v285_v19 }
  0xb6   :  { %v290_v35 = vadd.f32 %v289_v28, %v863_v29  ;;  %v312_v36 = vmul.f32 %v863_v29, %v863_v29 }
  0xb7   :  { %v257_v39 = vpop.f32.mrf.mxu2 }
  0xb8   :  { %v291_v42 = vadd.f32 %v290_v35, %v860_v25  ;;  %v327_v43 = vadd.f32 %v326_v34, %v312_v36  ;;  %v258_v48 = vadd.f32 %v257_v39, %v122_v30 }
  0xba   :  { %v292_v46 = vadd.f32 %v291_v42, %v865_v31  ;;  %v328_v47 = vadd.f32 %v327_v43, %v313_v37  ;;  %v887_v58 = vmax.f32 %v258_v48, 0.0 }
  0xbc   :  { %v329_v53 = vadd.f32 %v328_v47, %v314_v44  ;;  %v293_v55 = vadd.f32 %v292_v46, %v872_v40  ;;  %v318_v11 = vmul.f32 %v887_v58, %v887_v58 }
  0xbe   :  { %v294_v59 = vadd.f32 %v293_v55, %v877_v45  ;;  %v330_v60 = vadd.f32 %v329_v53, %v315_v51 }
  0xc0   :  { %v295_v4 = vadd.f32 %v294_v59, %v882_v52  ;;  %v331_v6 = vadd.f32 %v330_v60, %v316_v57 }
  0xc2   :  { %v296_v10 = vadd.f32 %v295_v4, %v887_v58  ;;  %v332_v13 = vadd.f32 %v331_v6, %v317_v3 }
  0xc4   :  { %v297_v16 = vadd.f32 %v296_v10, %v890_v54  ;;  %v333_v17 = vadd.f32 %v332_v13, %v318_v11 }
  0xc6   :  { %v298_v20 = vadd.f32 %v297_v16, %v895_v5  ;;  %v334_v21 = vadd.f32 %v333_v17, %v319_v14 }
  0xc8   :  { %v299_v23 = vadd.f32 %v298_v20, %v284_v15  ;;  %v335_v24 = vadd.f32 %v334_v21, %v320_v18 }
  0xca   :  { %v300_v27 = vadd.f32 %v299_v23, %v285_v19  ;;  %v336_v28 = vadd.f32 %v335_v24, %v321_v22 }
  0xcc   :  { %v301_v30 = vrot.slane %v300_v27, 4  ;;  %v337_v32 = vadd.f32 %v336_v28, %v322_v26 }
  0xce   :  { %v302_v33 = vadd.f32 %v301_v30, %v300_v27  ;;  %v338_v34 = vrot.slane %v337_v32, 4 }
  0xd0   :  { %v303_v35 = vrot.slane %v302_v33, 2  ;;  %v339_v36 = vadd.f32 %v338_v34, %v337_v32 }
  0xd2   :  { %v304_v37 = vadd.f32 %v303_v35, %v302_v33  ;;  %v340_v38 = vrot.slane %v339_v36, 2  ;;  %v632_v35 = vld [vmem:[%s952_s3] sm:$0xff] }
  0xd4   :  { %v305_v39 = vrot.slane %v304_v37, 1  ;;  %v341_v41 = vadd.f32 %v340_v38, %v339_v36  ;;  %v633_v36 = vld [vmem:[%s952_s3 + $0x8] sm:$0xff]  ;;  %s682_s3 = smov [#allocation3]  }
  0xd5   :  { %s560_s19 = sshll.u32 %s682_s3, 4  ;;  %s561_s19 = int_to_ptr.vmem [resolvable:$true] %s560_s19 }
  0xd6   :  { %v306_v42 = vadd.f32 %v305_v39, %v304_v37  ;;  %v342_v43 = vrot.slane %v341_v41, 1  ;;  %v411_v37 = vpop.permute.xlu1 %410  ;;  %v416_v39 = vpop.permute.xlu2 %415 }
  0xd8   :  { %v343_v44 = vadd.f32 %v342_v43, %v341_v41  ;;  %v906_v46 = vmul.f32 0.0078125, %v306_v42  ;;  %v421_v41 = vpop.permute.xlu0 %420 }
  0xda   :  { %v345_v47 = vmul.f32 0.0078125, %v343_v44  ;;  %v346_v48 = vmul.f32 %v906_v46, %v906_v46  ;;  %v363_v61 = vsub.f32 %v284_v15, %v906_v46  ;;  %v364_v63 = vsub.f32 %v285_v19, %v906_v46 }
  0xdb   :  { %v361_v3 = vsub.f32 %v890_v54, %v906_v46  ;;  %v357_v4 = vsub.f32 %v872_v40, %v906_v46  ;;  %v358_v6 = vsub.f32 %v877_v45, %v906_v46  ;;  %v362_v10 = vsub.f32 %v895_v5, %v906_v46 }
  0xdc   :  { %v347_v49 = vsub.f32 %v345_v47, %v346_v48  ;;  %v353_v11 = vsub.f32 %v852_v12, %v906_v46  ;;  %v354_v15 = vsub.f32 %v863_v29, %v906_v46  ;;  %v351_v54 = vsub.f32 %v840_v2, %v906_v46 }
  0xdd   :  { %v352_v45 = vsub.f32 %v844_v7, %v906_v46  ;;  %v359_v5 = vsub.f32 %v882_v52, %v906_v46  ;;  %v360_v29 = vsub.f32 %v887_v58, %v906_v46  ;;  %v355_v52 = vsub.f32 %v860_v25, %v906_v46 }
  0xde   :  { %v348_v50 = vmax.f32 %v347_v49, 0.0  ;;  %v356_v27 = vsub.f32 %v865_v31, %v906_v46  ;;  %v349_v32 = vsub.f32 %v838_v1, %v906_v46  ;;  %v350_v33 = vsub.f32 %v836_v62, %v906_v46 }
  0xe0   :  { %v365_v51 = vadd.f32 1e-05, %v348_v50 }
  0xe2   :  { %650 = vrsqrt.f32 %v365_v51  ;;  %vm372_vm4 = vweird.f32 %v365_v51 }
  0xe8   :  { %v651_v53 = vpop.eup %650 }
  0xe9   :  { %v367_v55 = vmul.f32 %v651_v53, %v365_v51  ;;  %vm373_vm3 = vweird.f32 %v651_v53 }
  0xea   :  { %vm374_vm5 = vmor %vm372_vm4, %vm373_vm3 }
  0xeb   :  { %v368_v56 = vmul.f32 %v651_v53, %v367_v55 }
  0xed   :  { %v369_v57 = vmul.f32 0.5, %v368_v56 }
  0xef   :  { %v370_v59 = vsub.f32 1.5, %v369_v57 }
  0xf1   :  { %v371_v60 = vmul.f32 %v651_v53, %v370_v59 }
  0xf3   :  { %v375_v0 = vsel %vm374_vm5, %v651_v53, %v371_v60  ;;  %v426_v53 = vpop.permute.xlu1 %425 }
  0xf4   :  { %v390_v8 = vmul.f32 %v375_v0, %v363_v61  ;;  %v391_v9 = vmul.f32 %v375_v0, %v364_v63  ;;  %v384_v13 = vmul.f32 %v375_v0, %v357_v4  ;;  %v385_v14 = vmul.f32 %v375_v0, %v358_v6 }
  0xf5   :  { %v388_v16 = vmul.f32 %v375_v0, %v361_v3  ;;  %v389_v17 = vmul.f32 %v375_v0, %v362_v10  ;;  %v380_v19 = vmul.f32 %v375_v0, %v353_v11  ;;  %v381_v12 = vmul.f32 %v375_v0, %v354_v15 }
  0xf6   :  { %v403_v40 = vpack.c.bf16 %v391_v9, %v390_v8  ;;  %v400_v18 = vpack.c.bf16 %v385_v14, %v384_v13  ;;  %v378_v20 = vmul.f32 %v375_v0, %v351_v54  ;;  %v379_v21 = vmul.f32 %v375_v0, %v352_v45 }
  0xf7   :  { %v398_v2 = vpack.c.bf16 %v381_v12, %v380_v19  ;;  %v402_v22 = vpack.c.bf16 %v389_v17, %v388_v16  ;;  %v386_v23 = vmul.f32 %v375_v0, %v359_v5  ;;  %v387_v24 = vmul.f32 %v375_v0, %v360_v29 }
  0xf8   :  { %440 = vmatpush.bf16.msra.mxu1 %v403_v40  ;;  %636 = vmatpush.bf16.msrb.mxu3 %v403_v40  ;;  %v397_v26 = vpack.c.bf16 %v379_v21, %v378_v20  ;;  %v382_v28 = vmul.f32 %v375_v0, %v355_v52  ;;  %v383_v58 = vmul.f32 %v375_v0, %v356_v27 }
  0xf9   :  { %v401_v7 = vpack.c.bf16 %v387_v24, %v386_v23  ;;  %v376_v34 = vmul.f32 %v375_v0, %v349_v32  ;;  %v377_v25 = vmul.f32 %v375_v0, %v350_v33  ;;  %v516_v23 = vpop.permute.xlu2 %515 }
  0xfa   :  { %v399_v30 = vpack.c.bf16 %v383_v58, %v382_v28 }
  0xfb   :  { %v396_v31 = vpack.c.bf16 %v377_v25, %v376_v34  ;;  %v521_v34 = vpop.permute.xlu0 %520 }
  0xfc   :  { %441 = vmatpush.bf16.msra.mxu1 %v402_v22  ;;  %637 = vmatpush.bf16.msrb.mxu3 %v402_v22 }
 0x100   :  { %442 = vmatpush.bf16.msra.mxu1 %v401_v7  ;;  %638 = vmatpush.bf16.msrb.mxu3 %v401_v7 }
 0x104   :  { %443 = vmatpush.bf16.msra.mxu1 %v400_v18  ;;  %639 = vmatpush.bf16.msrb.mxu3 %v400_v18 }
 0x108   :  { %444 = vmatpush.bf16.msra.mxu1 %v399_v30  ;;  %640 = vmatpush.bf16.msrb.mxu3 %v399_v30 }
 0x10c   :  { %445 = vmatpush.bf16.msra.mxu1 %v398_v2  ;;  %641 = vmatpush.bf16.msrb.mxu3 %v398_v2 }
 0x110   :  { %446 = vmatpush.bf16.msra.mxu1 %v397_v26  ;;  %642 = vmatpush.bf16.msrb.mxu3 %v397_v26 }
 0x114   :  { %447 = vmatpush.bf16.msra.mxu1 %v396_v31  ;;  %643 = vmatpush.bf16.msrb.mxu3 %v396_v31 }
 0x117   :  { %448 = vmatmul.bf16.vlgmr.msra.gmra.mxu1 %v632_v35  ;;  %453 = vmatmul.bf16.vlgmr.msrb.gmra.mxu3 %v633_v36  ;;  %v526_v36 = vpop.permute.xlu1 %525 }
 0x194   :  { %v449_v1 = vpop.f32.mrf.mxu1 }
 0x195   :  { %v450_v62 = vadd.f32 %v449_v1, %v411_v37 }
 0x197   :  { %v459_v43 = vmax.f32 %v450_v62, 0.0  ;;  %v531_v62 = vpop.permute.xlu2 %530 }
 0x199   :  { %v472_v48 = vmul.f32 %v459_v43, %v459_v43 }
 0x19a   :  { %v454_v38 = vpop.f32.mrf.mxu3 }
 0x19b   :  { %v455_v44 = vadd.f32 %v454_v38, %v421_v41 }
 0x19c   :  { %v451_v42 = vpop.f32.mrf.mxu1 }
 0x19d   :  { %v452_v46 = vadd.f32 %v451_v42, %v416_v39  ;;  %v461_v49 = vmax.f32 %v455_v44, 0.0 }
 0x19f   :  { %v460_v47 = vmax.f32 %v452_v46, 0.0  ;;  %v474_v59 = vmul.f32 %v461_v49, %v461_v49 }
 0x1a1   :  { %v463_v50 = vadd.f32 %v460_v47, %v459_v43  ;;  %v473_v51 = vmul.f32 %v460_v47, %v460_v47 }
 0x1a2   :  { %v456_v55 = vpop.f32.mrf.mxu3 }
 0x1a3   :  { %v476_v56 = vadd.f32 %v473_v51, %v472_v48  ;;  %v457_v57 = vadd.f32 %v456_v55, %v426_v53  ;;  %v464_v61 = vadd.f32 %v463_v50, %v461_v49 }
 0x1a5   :  { %v462_v60 = vmax.f32 %v457_v57, 0.0  ;;  %v477_v3 = vadd.f32 %v476_v56, %v474_v59 }
 0x1a7   :  { %v465_v63 = vadd.f32 %v464_v61, %v462_v60  ;;  %v475_v0 = vmul.f32 %v462_v60, %v462_v60 }
 0x1a9   :  { %v466_v4 = vrot.slane %v465_v63, 4  ;;  %v478_v6 = vadd.f32 %v477_v3, %v475_v0 }
 0x1ab   :  { %v467_v8 = vadd.f32 %v466_v4, %v465_v63  ;;  %v479_v9 = vrot.slane %v478_v6, 4 }
 0x1ad   :  { %v468_v10 = vrot.slane %v467_v8, 2  ;;  %v480_v11 = vadd.f32 %v479_v9, %v478_v6 }
 0x1af   :  { %v469_v13 = vadd.f32 %v468_v10, %v467_v8  ;;  %v481_v14 = vrot.slane %v480_v11, 2 }
 0x1b1   :  { %v470_v15 = vrot.slane %v469_v13, 1  ;;  %v482_v54 = vadd.f32 %v481_v14, %v480_v11 }
 0x1b3   :  { %v471_v40 = vadd.f32 %v470_v15, %v469_v13  ;;  %v483_v16 = vrot.slane %v482_v54, 1 }
 0x1b5   :  { %v484_v17 = vadd.f32 %v483_v16, %v482_v54  ;;  %v485_v45 = vmul.f32 0.03125, %v471_v40 }
 0x1b7   :  { %v486_v5 = vmul.f32 0.03125, %v484_v17  ;;  %v487_v18 = vmul.f32 %v485_v45, %v485_v45  ;;  %v490_v7 = vsub.f32 %v459_v43, %v485_v45  ;;  %v491_v52 = vsub.f32 %v460_v47, %v485_v45  ;;  %v550_v47 = vpop.permute.xlu0 %549 }
 0x1b8   :  { %v492_v27 = vsub.f32 %v461_v49, %v485_v45  ;;  %v493_v58 = vsub.f32 %v462_v60, %v485_v45  ;;  %v552_v49 = vperm.slane %v550_v47, 0 }
 0x1b9   :  { %v488_v19 = vsub.f32 %v486_v5, %v487_v18 }
 0x1bb   :  { %v489_v12 = vmax.f32 %v488_v19, 0.0 }
 0x1bd   :  { %v494_v29 = vadd.f32 1e-05, %v489_v12 }
 0x1bf   :  { %652 = vrsqrt.f32 %v494_v29  ;;  %vm501_vm7 = vweird.f32 %v494_v29 }
 0x1c5   :  { %v653_v20 = vpop.eup %652 }
 0x1c6   :  { %v496_v21 = vmul.f32 %v653_v20, %v494_v29  ;;  %vm502_vm6 = vweird.f32 %v653_v20 }
 0x1c7   :  { %vm503_vm8 = vmor %vm501_vm7, %vm502_vm6 }
 0x1c8   :  { %v497_v2 = vmul.f32 %v653_v20, %v496_v21 }
 0x1ca   :  { %v498_v22 = vmul.f32 0.5, %v497_v2 }
 0x1cc   :  { %v499_v24 = vsub.f32 1.5, %v498_v22 }
 0x1ce   :  { %v500_v26 = vmul.f32 %v653_v20, %v499_v24 }
 0x1d0   :  { %v504_v28 = vsel %vm503_vm8, %v653_v20, %v500_v26 }
 0x1d1   :  { %v505_v30 = vmul.f32 %v504_v28, %v490_v7  ;;  %v506_v32 = vmul.f32 %v504_v28, %v491_v52  ;;  %v507_v33 = vmul.f32 %v504_v28, %v492_v27  ;;  %v508_v25 = vmul.f32 %v504_v28, %v493_v58 }
 0x1d3   :  { %v533_v31 = vmul.f32 %v516_v23, %v505_v30  ;;  %v534_v35 = vmul.f32 %v521_v34, %v506_v32  ;;  %v535_v1 = vmul.f32 %v526_v36, %v507_v33  ;;  %v536_v38 = vmul.f32 %v531_v62, %v508_v25 }
 0x1d5   :  { %v537_v37 = vadd.f32 %v534_v35, %v533_v31 }
 0x1d7   :  { %v538_v39 = vadd.f32 %v537_v37, %v535_v1 }
 0x1d9   :  { %v539_v41 = vadd.f32 %v538_v39, %v536_v38 }
 0x1db   :  { %v540_v42 = vrot.slane %v539_v41, 4 }
 0x1dd   :  { %v541_v43 = vadd.f32 %v540_v42, %v539_v41 }
 0x1df   :  { %v542_v44 = vrot.slane %v541_v43, 2 }
 0x1e1   :  { %v543_v46 = vadd.f32 %v542_v44, %v541_v43 }
 0x1e3   :  { %v544_v48 = vrot.slane %v543_v46, 1 }
 0x1e5   :  { %v545_v50 = vadd.f32 %v544_v48, %v543_v46 }
 0x1e7   :  { %v553_v51 = vadd.f32 %v552_v49, %v545_v50 }
 0x1e9   :  { %554 = vst [vmem:[#allocation3] sm:$0x1] %v553_v51 }
 0x1ea   :  { %565 = dma.vmem_to_hbm [thread:$0]  %s561_s19, 16, %s563_s22, [#allocation4]  }
 0x1eb   :  { %678 = dma.done.wait [#allocation4], 16  }
 0x1ec   :  { %679 = vsyncadd [#allocation4], 4294967280 }
 0x1ed   :  { %570 = vsyncpa [#allocation4], 1 }

</bundles_post_ra>
